<compile_context>
chip_gen: v7x
topology: tpu7x:2x2x1
jax: 0.10.0
libtpu: 0.0.40
codegen_flags: <defaults>
</compile_context>

<pallas_src>
import jax
import jax.numpy as jnp
from jax import lax
from jax.experimental import pallas as pl
from jax.experimental.pallas import tpu as pltpu


def danet_kernel(x_ref, wih_ref, whh_ref, b_ref, wlin_ref, blin_ref,
                 h0_ref, c0_ref, out_ref, xg_ref, h_seq_ref):
    """One invocation computes the full (seq_len, output_dim) result."""
    H = whh_ref.shape[0]
    seq_len = x_ref.shape[0]

    whh = whh_ref[...]            # (H, 4H) — loop invariant, load once

    # ---- Hoisted input->hidden projection (off the critical path) --------
    # (seq_len, in) @ (in, 4H) + (1, 4H) bias, done once before the loop.
    xg_ref[...] = (jnp.dot(x_ref[...], wih_ref[...],
                           preferred_element_type=jnp.float32)
                   + b_ref[...])

    # ---- Serial recurrence: only h @ W_hh + gate math remains ------------
    def step(t, carry):
        h, c = carry                                          # each (1, H)
        gates = (xg_ref[pl.ds(t, 1), :]
                 + jnp.dot(h, whh, preferred_element_type=jnp.float32))

        # Whole-vreg activations (2 EUP pushes), slice afterwards.
        sig = jax.nn.sigmoid(gates)                           # (1, 4H)
        tnh = jnp.tanh(gates)                                 # (1, 4H)
        i_g = sig[:, 0:H]
        f_g = sig[:, H:2 * H]
        g_g = tnh[:, 2 * H:3 * H]
        o_g = sig[:, 3 * H:4 * H]

        c_new = f_g * c + i_g * g_g
        h_new = o_g * jnp.tanh(c_new)
        h_seq_ref[pl.ds(t, 1), :] = h_new                     # stash h_t
        return (h_new, c_new)

    # seq_len is static & small -> fully unroll for LLO scheduling visibility.
    lax.fori_loop(0, seq_len, step, (h0_ref[...], c0_ref[...]), unroll=True)

    # ---- Output projection + softmax, hoisted after the loop -------------
    y = (jnp.dot(h_seq_ref[...], wlin_ref[...],
                 preferred_element_type=jnp.float32)
         + blin_ref[...])                                     # (seq_len, out)
    y = y - jnp.max(y, axis=-1, keepdims=True)
    e = jnp.exp(y)
    inv = pl.reciprocal(jnp.sum(e, axis=-1, keepdims=True), approx=True)
    out_ref[...] = e * inv


def prepare_params(w_ih, w_hh, b_ih, b_hh, w_lin, b_lin):
    """One-time parameter prep: PyTorch layout -> kernel layout.
       w_ih: (4H, input_dim), w_hh: (4H, H), b_ih/b_hh: (4H,),
       w_lin: (output_dim, H), b_lin: (output_dim,)."""
    return {
        "wih_t": jnp.transpose(w_ih),              # (input_dim, 4H)
        "whh_t": jnp.transpose(w_hh),              # (H, 4H)
        "b":     (b_ih + b_hh).reshape(1, -1),     # (1, 4H)
        "wlin_t": jnp.transpose(w_lin),            # (H, output_dim)
        "blin":  b_lin.reshape(1, -1),             # (1, output_dim)
    }


@jax.jit
def danetwork_forward(x, params, h0, c0):
    """x: (seq_len, input_dim); params from prepare_params; h0/c0: (1, H).
       Returns (seq_len, output_dim) float32."""
    seq_len, _ = x.shape
    H = params["whh_t"].shape[0]
    out_dim = params["wlin_t"].shape[1]

    vmem = pl.BlockSpec(memory_space=pltpu.MemorySpace.VMEM)
    return pl.pallas_call(
        danet_kernel,
        out_shape=jax.ShapeDtypeStruct((seq_len, out_dim), jnp.float32),
        in_specs=[vmem] * 8,
        out_specs=vmem,
        scratch_shapes=[
            pltpu.VMEM((seq_len, 4 * H), jnp.float32),   # precomputed x-gates
            pltpu.VMEM((seq_len, H), jnp.float32),       # per-step hidden h_t
        ],
    )(x, params["wih_t"], params["whh_t"], params["b"],
      params["wlin_t"], params["blin"], h0, c0)


def danetwork_forward_ref(x, w_ih, w_hh, b_ih, b_hh, w_lin, b_lin, h0, c0):
    """Pure-JAX reference (same math as torch nn.LSTM + Linear + softmax)."""
    H = w_hh.shape[1]

    def step(carry, x_t):
        h, c = carry
        gates = x_t @ w_ih.T + b_ih + h @ w_hh.T + b_hh
        i_g = jax.nn.sigmoid(gates[:, 0:H])
        f_g = jax.nn.sigmoid(gates[:, H:2 * H])
        g_g = jnp.tanh(gates[:, 2 * H:3 * H])
        o_g = jax.nn.sigmoid(gates[:, 3 * H:4 * H])
        c_new = f_g * c + i_g * g_g
        h_new = o_g * jnp.tanh(c_new)
        y = jax.nn.softmax(h_new @ w_lin.T + b_lin, axis=-1)
        return (h_new, c_new), y[0]

    _, ys = lax.scan(step, (h0, c0), x[:, None, :])
    return ys


if __name__ == "__main__":
    input_dim, hidden_dim, output_dim, seq_len = 4, 32, 4, 8

    key = jax.random.PRNGKey(0)
    ks = jax.random.split(key, 10)
    s_lstm = 1.0 / jnp.sqrt(hidden_dim)
    s_lin = 1.0 / jnp.sqrt(hidden_dim)

    # Deterministic synthetic parameters (PyTorch shapes / gate order [i,f,g,o]).
    w_ih = jax.random.uniform(ks[0], (4 * hidden_dim, input_dim),
                              jnp.float32, -s_lstm, s_lstm)
    w_hh = jax.random.uniform(ks[1], (4 * hidden_dim, hidden_dim),
                              jnp.float32, -s_lstm, s_lstm)
    b_ih = jax.random.uniform(ks[2], (4 * hidden_dim,), jnp.float32, -s_lstm, s_lstm)
    b_hh = jax.random.uniform(ks[3], (4 * hidden_dim,), jnp.float32, -s_lstm, s_lstm)
    w_lin = jax.random.uniform(ks[4], (output_dim, hidden_dim),
                               jnp.float32, -s_lin, s_lin)
    b_lin = jax.random.uniform(ks[5], (output_dim,), jnp.float32, -s_lin, s_lin)

    # Initial hidden state (torch.randn in the original; deterministic here).
    h0 = jax.random.normal(ks[6], (1, hidden_dim), jnp.float32)
    c0 = jax.random.normal(ks[7], (1, hidden_dim), jnp.float32)

    # Example input sequence.
    x = jax.random.normal(ks[8], (seq_len, input_dim), jnp.float32)

    params = prepare_params(w_ih, w_hh, b_ih, b_hh, w_lin, b_lin)

    out = danetwork_forward(x, params, h0, c0)
    out = jax.block_until_ready(out)

    ref = danetwork_forward_ref(x, w_ih, w_hh, b_ih, b_hh, w_lin, b_lin, h0, c0)
    assert out.shape == (seq_len, output_dim)
    # Slightly loosened tolerance: softmax denominator uses the EUP approximate
    # reciprocal (pl.reciprocal(..., approx=True)).
    assert jnp.allclose(out, ref, atol=1e-3, rtol=1e-3), "mismatch vs JAX reference"

    print("KERNEL_OK")
</pallas_src>

<mosaic_0001>
module attributes {stable_mosaic.version = 11 : i64} {
  func.func @danet_kernel(%arg0: memref<8x4xf32, #tpu.memory_space<vmem>>, %arg1: memref<4x128xf32, #tpu.memory_space<vmem>>, %arg2: memref<32x128xf32, #tpu.memory_space<vmem>>, %arg3: memref<1x128xf32, #tpu.memory_space<vmem>>, %arg4: memref<32x4xf32, #tpu.memory_space<vmem>>, %arg5: memref<1x4xf32, #tpu.memory_space<vmem>>, %arg6: memref<1x32xf32, #tpu.memory_space<vmem>>, %arg7: memref<1x32xf32, #tpu.memory_space<vmem>>, %arg8: memref<8x4xf32, #tpu.memory_space<vmem>>, %arg9: memref<8x128xf32, #tpu.memory_space<vmem>>, %arg10: memref<8x32xf32, #tpu.memory_space<vmem>>) attributes {dimension_semantics = [], scalar_prefetch = 0 : i64, scratch_operands = 2 : i64, tpu.core_type = #tpu.core_type<tc>} {
    %c0 = arith.constant 0 : index
    %c0_0 = arith.constant 0 : index
    %0 = vector.load %arg2[%c0, %c0_0] : memref<32x128xf32, #tpu.memory_space<vmem>>, vector<32x128xf32>
    %c0_1 = arith.constant 0 : index
    %c0_2 = arith.constant 0 : index
    %1 = vector.load %arg0[%c0_1, %c0_2] : memref<8x4xf32, #tpu.memory_space<vmem>>, vector<8x4xf32>
    %c0_3 = arith.constant 0 : index
    %c0_4 = arith.constant 0 : index
    %2 = vector.load %arg1[%c0_3, %c0_4] : memref<4x128xf32, #tpu.memory_space<vmem>>, vector<4x128xf32>
    %cst = arith.constant dense<0.000000e+00> : vector<8x128xf32>
    %3 = tpu.matmul %1, %2, %cst {dimension_numbers = #tpu.dot_dimension_numbers<[1], [0], [0], [1], [0, 0, 1, 1], [], []>} : vector<8x4xf32>, vector<4x128xf32>, vector<8x128xf32> -> vector<8x128xf32>
    %c0_5 = arith.constant 0 : index
    %c0_6 = arith.constant 0 : index
    %4 = vector.load %arg3[%c0_5, %c0_6] : memref<1x128xf32, #tpu.memory_space<vmem>>, vector<1x128xf32>
    %5 = vector.broadcast %4 : vector<1x128xf32> to vector<8x128xf32>
    %6 = arith.addf %3, %5 : vector<8x128xf32>
    %c0_7 = arith.constant 0 : index
    %c0_8 = arith.constant 0 : index
    %7 = vector.load %arg9[%c0_7, %c0_8] : memref<8x128xf32, #tpu.memory_space<vmem>>, vector<8x128xf32>
    tpu.vector_store %arg9[%c0_7, %c0_8], %6 {strides = array<i32>} : memref<8x128xf32, #tpu.memory_space<vmem>>, vector<8x128xf32>,
    %c0_9 = arith.constant 0 : index
    %c0_10 = arith.constant 0 : index
    %8 = vector.load %arg6[%c0_9, %c0_10] : memref<1x32xf32, #tpu.memory_space<vmem>>, vector<1x32xf32>
    %c0_11 = arith.constant 0 : index
    %c0_12 = arith.constant 0 : index
    %9 = vector.load %arg7[%c0_11, %c0_12] : memref<1x32xf32, #tpu.memory_space<vmem>>, vector<1x32xf32>
    %c0_i32 = arith.constant 0 : i32
    %10 = arith.index_cast %c0_i32 : i32 to index
    %c0_13 = arith.constant 0 : index
    %11 = vector.load %arg9[%10, %c0_13] : memref<8x128xf32, #tpu.memory_space<vmem>>, vector<1x128xf32>
    %cst_14 = arith.constant dense<0.000000e+00> : vector<1x128xf32>
    %12 = tpu.matmul %8, %0, %cst_14 {dimension_numbers = #tpu.dot_dimension_numbers<[1], [0], [0], [1], [0, 0, 1, 1], [], []>} : vector<1x32xf32>, vector<32x128xf32>, vector<1x128xf32> -> vector<1x128xf32>
    %13 = arith.addf %11, %12 : vector<1x128xf32>
    %14 = arith.negf %13 : vector<1x128xf32>
    %15 = math.exp %14 : vector<1x128xf32>
    %cst_15 = arith.constant 1.000000e+00 : f32
    %16 = vector.broadcast %cst_15 : f32 to vector<1x128xf32>
    %17 = arith.addf %16, %15 : vector<1x128xf32>
    %18 = arith.divf %16, %17 : vector<1x128xf32>
    %19 = math.tanh %13 : vector<1x128xf32>
    %20 = vector.extract_strided_slice %18 {offsets = [0, 0], sizes = [1, 32], strides = [1, 1]} : vector<1x128xf32> to vector<1x32xf32>
    %21 = vector.extract_strided_slice %18 {offsets = [0, 32], sizes = [1, 32], strides = [1, 1]} : vector<1x128xf32> to vector<1x32xf32>
    %22 = vector.extract_strided_slice %19 {offsets = [0, 64], sizes = [1, 32], strides = [1, 1]} : vector<1x128xf32> to vector<1x32xf32>
    %23 = vector.extract_strided_slice %18 {offsets = [0, 96], sizes = [1, 32], strides = [1, 1]} : vector<1x128xf32> to vector<1x32xf32>
    %24 = arith.mulf %21, %9 : vector<1x32xf32>
    %25 = arith.mulf %20, %22 : vector<1x32xf32>
    %26 = arith.addf %24, %25 : vector<1x32xf32>
    %27 = math.tanh %26 : vector<1x32xf32>
    %28 = arith.mulf %23, %27 : vector<1x32xf32>
    %29 = arith.index_cast %c0_i32 : i32 to index
    %c0_16 = arith.constant 0 : index
    %30 = vector.load %arg10[%29, %c0_16] : memref<8x32xf32, #tpu.memory_space<vmem>>, vector<1x32xf32>
    tpu.vector_store %arg10[%29, %c0_16], %28 {strides = array<i32>} : memref<8x32xf32, #tpu.memory_space<vmem>>, vector<1x32xf32>,
    %c1_i32 = arith.constant 1 : i32
    %31 = arith.index_cast %c1_i32 : i32 to index
    %c0_17 = arith.constant 0 : index
    %32 = vector.load %arg9[%31, %c0_17] : memref<8x128xf32, #tpu.memory_space<vmem>>, vector<1x128xf32>
    %cst_18 = arith.constant dense<0.000000e+00> : vector<1x128xf32>
    %33 = tpu.matmul %28, %0, %cst_18 {dimension_numbers = #tpu.dot_dimension_numbers<[1], [0], [0], [1], [0, 0, 1, 1], [], []>} : vector<1x32xf32>, vector<32x128xf32>, vector<1x128xf32> -> vector<1x128xf32>
    %34 = arith.addf %32, %33 : vector<1x128xf32>
    %35 = arith.negf %34 : vector<1x128xf32>
    %36 = math.exp %35 : vector<1x128xf32>
    %cst_19 = arith.constant 1.000000e+00 : f32
    %37 = vector.broadcast %cst_19 : f32 to vector<1x128xf32>
    %38 = arith.addf %37, %36 : vector<1x128xf32>
    %39 = arith.divf %37, %38 : vector<1x128xf32>
    %40 = math.tanh %34 : vector<1x128xf32>
    %41 = vector.extract_strided_slice %39 {offsets = [0, 0], sizes = [1, 32], strides = [1, 1]} : vector<1x128xf32> to vector<1x32xf32>
    %42 = vector.extract_strided_slice %39 {offsets = [0, 32], sizes = [1, 32], strides = [1, 1]} : vector<1x128xf32> to vector<1x32xf32>
    %43 = vector.extract_strided_slice %40 {offsets = [0, 64], sizes = [1, 32], strides = [1, 1]} : vector<1x128xf32> to vector<1x32xf32>
    %44 = vector.extract_strided_slice %39 {offsets = [0, 96], sizes = [1, 32], strides = [1, 1]} : vector<1x128xf32> to vector<1x32xf32>
    %45 = arith.mulf %42, %26 : vector<1x32xf32>
    %46 = arith.mulf %41, %43 : vector<1x32xf32>
    %47 = arith.addf %45, %46 : vector<1x32xf32>
    %48 = math.tanh %47 : vector<1x32xf32>
    %49 = arith.mulf %44, %48 : vector<1x32xf32>
    %50 = arith.index_cast %c1_i32 : i32 to index
    %c0_20 = arith.constant 0 : index
    %51 = vector.load %arg10[%50, %c0_20] : memref<8x32xf32, #tpu.memory_space<vmem>>, vector<1x32xf32>
    tpu.vector_store %arg10[%50, %c0_20], %49 {strides = array<i32>} : memref<8x32xf32, #tpu.memory_space<vmem>>, vector<1x32xf32>,
    %c2_i32 = arith.constant 2 : i32
    %52 = arith.index_cast %c2_i32 : i32 to index
    %c0_21 = arith.constant 0 : index
    %53 = vector.load %arg9[%52, %c0_21] : memref<8x128xf32, #tpu.memory_space<vmem>>, vector<1x128xf32>
    %cst_22 = arith.constant dense<0.000000e+00> : vector<1x128xf32>
    %54 = tpu.matmul %49, %0, %cst_22 {dimension_numbers = #tpu.dot_dimension_numbers<[1], [0], [0], [1], [0, 0, 1, 1], [], []>} : vector<1x32xf32>, vector<32x128xf32>, vector<1x128xf32> -> vector<1x128xf32>
    %55 = arith.addf %53, %54 : vector<1x128xf32>
    %56 = arith.negf %55 : vector<1x128xf32>
    %57 = math.exp %56 : vector<1x128xf32>
    %cst_23 = arith.constant 1.000000e+00 : f32
    %58 = vector.broadcast %cst_23 : f32 to vector<1x128xf32>
    %59 = arith.addf %58, %57 : vector<1x128xf32>
    %60 = arith.divf %58, %59 : vector<1x128xf32>
    %61 = math.tanh %55 : vector<1x128xf32>
    %62 = vector.extract_strided_slice %60 {offsets = [0, 0], sizes = [1, 32], strides = [1, 1]} : vector<1x128xf32> to vector<1x32xf32>
    %63 = vector.extract_strided_slice %60 {offsets = [0, 32], sizes = [1, 32], strides = [1, 1]} : vector<1x128xf32> to vector<1x32xf32>
    %64 = vector.extract_strided_slice %61 {offsets = [0, 64], sizes = [1, 32], strides = [1, 1]} : vector<1x128xf32> to vector<1x32xf32>
    %65 = vector.extract_strided_slice %60 {offsets = [0, 96], sizes = [1, 32], strides = [1, 1]} : vector<1x128xf32> to vector<1x32xf32>
    %66 = arith.mulf %63, %47 : vector<1x32xf32>
    %67 = arith.mulf %62, %64 : vector<1x32xf32>
    %68 = arith.addf %66, %67 : vector<1x32xf32>
    %69 = math.tanh %68 : vector<1x32xf32>
    %70 = arith.mulf %65, %69 : vector<1x32xf32>
    %71 = arith.index_cast %c2_i32 : i32 to index
    %c0_24 = arith.constant 0 : index
    %72 = vector.load %arg10[%71, %c0_24] : memref<8x32xf32, #tpu.memory_space<vmem>>, vector<1x32xf32>
    tpu.vector_store %arg10[%71, %c0_24], %70 {strides = array<i32>} : memref<8x32xf32, #tpu.memory_space<vmem>>, vector<1x32xf32>,
    %c3_i32 = arith.constant 3 : i32
    %73 = arith.index_cast %c3_i32 : i32 to index
    %c0_25 = arith.constant 0 : index
    %74 = vector.load %arg9[%73, %c0_25] : memref<8x128xf32, #tpu.memory_space<vmem>>, vector<1x128xf32>
    %cst_26 = arith.constant dense<0.000000e+00> : vector<1x128xf32>
    %75 = tpu.matmul %70, %0, %cst_26 {dimension_numbers = #tpu.dot_dimension_numbers<[1], [0], [0], [1], [0, 0, 1, 1], [], []>} : vector<1x32xf32>, vector<32x128xf32>, vector<1x128xf32> -> vector<1x128xf32>
    %76 = arith.addf %74, %75 : vector<1x128xf32>
    %77 = arith.negf %76 : vector<1x128xf32>
    %78 = math.exp %77 : vector<1x128xf32>
    %cst_27 = arith.constant 1.000000e+00 : f32
    %79 = vector.broadcast %cst_27 : f32 to vector<1x128xf32>
    %80 = arith.addf %79, %78 : vector<1x128xf32>
    %81 = arith.divf %79, %80 : vector<1x128xf32>
    %82 = math.tanh %76 : vector<1x128xf32>
    %83 = vector.extract_strided_slice %81 {offsets = [0, 0], sizes = [1, 32], strides = [1, 1]} : vector<1x128xf32> to vector<1x32xf32>
    %84 = vector.extract_strided_slice %81 {offsets = [0, 32], sizes = [1, 32], strides = [1, 1]} : vector<1x128xf32> to vector<1x32xf32>
    %85 = vector.extract_strided_slice %82 {offsets = [0, 64], sizes = [1, 32], strides = [1, 1]} : vector<1x128xf32> to vector<1x32xf32>
    %86 = vector.extract_strided_slice %81 {offsets = [0, 96], sizes = [1, 32], strides = [1, 1]} : vector<1x128xf32> to vector<1x32xf32>
    %87 = arith.mulf %84, %68 : vector<1x32xf32>
    %88 = arith.mulf %83, %85 : vector<1x32xf32>
    %89 = arith.addf %87, %88 : vector<1x32xf32>
    %90 = math.tanh %89 : vector<1x32xf32>
    %91 = arith.mulf %86, %90 : vector<1x32xf32>
    %92 = arith.index_cast %c3_i32 : i32 to index
    %c0_28 = arith.constant 0 : index
    %93 = vector.load %arg10[%92, %c0_28] : memref<8x32xf32, #tpu.memory_space<vmem>>, vector<1x32xf32>
    tpu.vector_store %arg10[%92, %c0_28], %91 {strides = array<i32>} : memref<8x32xf32, #tpu.memory_space<vmem>>, vector<1x32xf32>,
    %c4_i32 = arith.constant 4 : i32
    %94 = arith.index_cast %c4_i32 : i32 to index
    %c0_29 = arith.constant 0 : index
    %95 = vector.load %arg9[%94, %c0_29] : memref<8x128xf32, #tpu.memory_space<vmem>>, vector<1x128xf32>
    %cst_30 = arith.constant dense<0.000000e+00> : vector<1x128xf32>
    %96 = tpu.matmul %91, %0, %cst_30 {dimension_numbers = #tpu.dot_dimension_numbers<[1], [0], [0], [1], [0, 0, 1, 1], [], []>} : vector<1x32xf32>, vector<32x128xf32>, vector<1x128xf32> -> vector<1x128xf32>
    %97 = arith.addf %95, %96 : vector<1x128xf32>
    %98 = arith.negf %97 : vector<1x128xf32>
    %99 = math.exp %98 : vector<1x128xf32>
    %cst_31 = arith.constant 1.000000e+00 : f32
    %100 = vector.broadcast %cst_31 : f32 to vector<1x128xf32>
    %101 = arith.addf %100, %99 : vector<1x128xf32>
    %102 = arith.divf %100, %101 : vector<1x128xf32>
    %103 = math.tanh %97 : vector<1x128xf32>
    %104 = vector.extract_strided_slice %102 {offsets = [0, 0], sizes = [1, 32], strides = [1, 1]} : vector<1x128xf32> to vector<1x32xf32>
    %105 = vector.extract_strided_slice %102 {offsets = [0, 32], sizes = [1, 32], strides = [1, 1]} : vector<1x128xf32> to vector<1x32xf32>
    %106 = vector.extract_strided_slice %103 {offsets = [0, 64], sizes = [1, 32], strides = [1, 1]} : vector<1x128xf32> to vector<1x32xf32>
    %107 = vector.extract_strided_slice %102 {offsets = [0, 96], sizes = [1, 32], strides = [1, 1]} : vector<1x128xf32> to vector<1x32xf32>
    %108 = arith.mulf %105, %89 : vector<1x32xf32>
    %109 = arith.mulf %104, %106 : vector<1x32xf32>
    %110 = arith.addf %108, %109 : vector<1x32xf32>
    %111 = math.tanh %110 : vector<1x32xf32>
    %112 = arith.mulf %107, %111 : vector<1x32xf32>
    %113 = arith.index_cast %c4_i32 : i32 to index
    %c0_32 = arith.constant 0 : index
    %114 = vector.load %arg10[%113, %c0_32] : memref<8x32xf32, #tpu.memory_space<vmem>>, vector<1x32xf32>
    tpu.vector_store %arg10[%113, %c0_32], %112 {strides = array<i32>} : memref<8x32xf32, #tpu.memory_space<vmem>>, vector<1x32xf32>,
    %c5_i32 = arith.constant 5 : i32
    %115 = arith.index_cast %c5_i32 : i32 to index
    %c0_33 = arith.constant 0 : index
    %116 = vector.load %arg9[%115, %c0_33] : memref<8x128xf32, #tpu.memory_space<vmem>>, vector<1x128xf32>
    %cst_34 = arith.constant dense<0.000000e+00> : vector<1x128xf32>
    %117 = tpu.matmul %112, %0, %cst_34 {dimension_numbers = #tpu.dot_dimension_numbers<[1], [0], [0], [1], [0, 0, 1, 1], [], []>} : vector<1x32xf32>, vector<32x128xf32>, vector<1x128xf32> -> vector<1x128xf32>
    %118 = arith.addf %116, %117 : vector<1x128xf32>
    %119 = arith.negf %118 : vector<1x128xf32>
    %120 = math.exp %119 : vector<1x128xf32>
    %cst_35 = arith.constant 1.000000e+00 : f32
    %121 = vector.broadcast %cst_35 : f32 to vector<1x128xf32>
    %122 = arith.addf %121, %120 : vector<1x128xf32>
    %123 = arith.divf %121, %122 : vector<1x128xf32>
    %124 = math.tanh %118 : vector<1x128xf32>
    %125 = vector.extract_strided_slice %123 {offsets = [0, 0], sizes = [1, 32], strides = [1, 1]} : vector<1x128xf32> to vector<1x32xf32>
    %126 = vector.extract_strided_slice %123 {offsets = [0, 32], sizes = [1, 32], strides = [1, 1]} : vector<1x128xf32> to vector<1x32xf32>
    %127 = vector.extract_strided_slice %124 {offsets = [0, 64], sizes = [1, 32], strides = [1, 1]} : vector<1x128xf32> to vector<1x32xf32>
    %128 = vector.extract_strided_slice %123 {offsets = [0, 96], sizes = [1, 32], strides = [1, 1]} : vector<1x128xf32> to vector<1x32xf32>
    %129 = arith.mulf %126, %110 : vector<1x32xf32>
    %130 = arith.mulf %125, %127 : vector<1x32xf32>
    %131 = arith.addf %129, %130 : vector<1x32xf32>
    %132 = math.tanh %131 : vector<1x32xf32>
    %133 = arith.mulf %128, %132 : vector<1x32xf32>
    %134 = arith.index_cast %c5_i32 : i32 to index
    %c0_36 = arith.constant 0 : index
    %135 = vector.load %arg10[%134, %c0_36] : memref<8x32xf32, #tpu.memory_space<vmem>>, vector<1x32xf32>
    tpu.vector_store %arg10[%134, %c0_36], %133 {strides = array<i32>} : memref<8x32xf32, #tpu.memory_space<vmem>>, vector<1x32xf32>,
    %c6_i32 = arith.constant 6 : i32
    %136 = arith.index_cast %c6_i32 : i32 to index
    %c0_37 = arith.constant 0 : index
    %137 = vector.load %arg9[%136, %c0_37] : memref<8x128xf32, #tpu.memory_space<vmem>>, vector<1x128xf32>
    %cst_38 = arith.constant dense<0.000000e+00> : vector<1x128xf32>
    %138 = tpu.matmul %133, %0, %cst_38 {dimension_numbers = #tpu.dot_dimension_numbers<[1], [0], [0], [1], [0, 0, 1, 1], [], []>} : vector<1x32xf32>, vector<32x128xf32>, vector<1x128xf32> -> vector<1x128xf32>
    %139 = arith.addf %137, %138 : vector<1x128xf32>
    %140 = arith.negf %139 : vector<1x128xf32>
    %141 = math.exp %140 : vector<1x128xf32>
    %cst_39 = arith.constant 1.000000e+00 : f32
    %142 = vector.broadcast %cst_39 : f32 to vector<1x128xf32>
    %143 = arith.addf %142, %141 : vector<1x128xf32>
    %144 = arith.divf %142, %143 : vector<1x128xf32>
    %145 = math.tanh %139 : vector<1x128xf32>
    %146 = vector.extract_strided_slice %144 {offsets = [0, 0], sizes = [1, 32], strides = [1, 1]} : vector<1x128xf32> to vector<1x32xf32>
    %147 = vector.extract_strided_slice %144 {offsets = [0, 32], sizes = [1, 32], strides = [1, 1]} : vector<1x128xf32> to vector<1x32xf32>
    %148 = vector.extract_strided_slice %145 {offsets = [0, 64], sizes = [1, 32], strides = [1, 1]} : vector<1x128xf32> to vector<1x32xf32>
    %149 = vector.extract_strided_slice %144 {offsets = [0, 96], sizes = [1, 32], strides = [1, 1]} : vector<1x128xf32> to vector<1x32xf32>
    %150 = arith.mulf %147, %131 : vector<1x32xf32>
    %151 = arith.mulf %146, %148 : vector<1x32xf32>
    %152 = arith.addf %150, %151 : vector<1x32xf32>
    %153 = math.tanh %152 : vector<1x32xf32>
    %154 = arith.mulf %149, %153 : vector<1x32xf32>
    %155 = arith.index_cast %c6_i32 : i32 to index
    %c0_40 = arith.constant 0 : index
    %156 = vector.load %arg10[%155, %c0_40] : memref<8x32xf32, #tpu.memory_space<vmem>>, vector<1x32xf32>
    tpu.vector_store %arg10[%155, %c0_40], %154 {strides = array<i32>} : memref<8x32xf32, #tpu.memory_space<vmem>>, vector<1x32xf32>,
    %c7_i32 = arith.constant 7 : i32
    %157 = arith.index_cast %c7_i32 : i32 to index
    %c0_41 = arith.constant 0 : index
    %158 = vector.load %arg9[%157, %c0_41] : memref<8x128xf32, #tpu.memory_space<vmem>>, vector<1x128xf32>
    %cst_42 = arith.constant dense<0.000000e+00> : vector<1x128xf32>
    %159 = tpu.matmul %154, %0, %cst_42 {dimension_numbers = #tpu.dot_dimension_numbers<[1], [0], [0], [1], [0, 0, 1, 1], [], []>} : vector<1x32xf32>, vector<32x128xf32>, vector<1x128xf32> -> vector<1x128xf32>
    %160 = arith.addf %158, %159 : vector<1x128xf32>
    %161 = arith.negf %160 : vector<1x128xf32>
    %162 = math.exp %161 : vector<1x128xf32>
    %cst_43 = arith.constant 1.000000e+00 : f32
    %163 = vector.broadcast %cst_43 : f32 to vector<1x128xf32>
    %164 = arith.addf %163, %162 : vector<1x128xf32>
    %165 = arith.divf %163, %164 : vector<1x128xf32>
    %166 = math.tanh %160 : vector<1x128xf32>
    %167 = vector.extract_strided_slice %165 {offsets = [0, 0], sizes = [1, 32], strides = [1, 1]} : vector<1x128xf32> to vector<1x32xf32>
    %168 = vector.extract_strided_slice %165 {offsets = [0, 32], sizes = [1, 32], strides = [1, 1]} : vector<1x128xf32> to vector<1x32xf32>
    %169 = vector.extract_strided_slice %166 {offsets = [0, 64], sizes = [1, 32], strides = [1, 1]} : vector<1x128xf32> to vector<1x32xf32>
    %170 = vector.extract_strided_slice %165 {offsets = [0, 96], sizes = [1, 32], strides = [1, 1]} : vector<1x128xf32> to vector<1x32xf32>
    %171 = arith.mulf %168, %152 : vector<1x32xf32>
    %172 = arith.mulf %167, %169 : vector<1x32xf32>
    %173 = arith.addf %171, %172 : vector<1x32xf32>
    %174 = math.tanh %173 : vector<1x32xf32>
    %175 = arith.mulf %170, %174 : vector<1x32xf32>
    %176 = arith.index_cast %c7_i32 : i32 to index
    %c0_44 = arith.constant 0 : index
    %177 = vector.load %arg10[%176, %c0_44] : memref<8x32xf32, #tpu.memory_space<vmem>>, vector<1x32xf32>
    tpu.vector_store %arg10[%176, %c0_44], %175 {strides = array<i32>} : memref<8x32xf32, #tpu.memory_space<vmem>>, vector<1x32xf32>,
    %c8_i32 = arith.constant 8 : i32
    %c0_45 = arith.constant 0 : index
    %c0_46 = arith.constant 0 : index
    %178 = vector.load %arg10[%c0_45, %c0_46] : memref<8x32xf32, #tpu.memory_space<vmem>>, vector<8x32xf32>
    %c0_47 = arith.constant 0 : index
    %c0_48 = arith.constant 0 : index
    %179 = vector.load %arg4[%c0_47, %c0_48] : memref<32x4xf32, #tpu.memory_space<vmem>>, vector<32x4xf32>
    %cst_49 = arith.constant dense<0.000000e+00> : vector<8x4xf32>
    %180 = tpu.matmul %178, %179, %cst_49 {dimension_numbers = #tpu.dot_dimension_numbers<[1], [0], [0], [1], [0, 0, 1, 1], [], []>} : vector<8x32xf32>, vector<32x4xf32>, vector<8x4xf32> -> vector<8x4xf32>
    %c0_50 = arith.constant 0 : index
    %c0_51 = arith.constant 0 : index
    %181 = vector.load %arg5[%c0_50, %c0_51] : memref<1x4xf32, #tpu.memory_space<vmem>>, vector<1x4xf32>
    %182 = vector.broadcast %181 : vector<1x4xf32> to vector<8x4xf32>
    %183 = arith.addf %180, %182 : vector<8x4xf32>
    %cst_52 = arith.constant dense<0xFF800000> : vector<8xf32>
    %184 = vector.multi_reduction <maximumf>, %183, %cst_52 [1] : vector<8x4xf32> to vector<8xf32>
    %185 = vector.shape_cast %184 : vector<8xf32> to vector<8x1xf32>
    %186 = vector.broadcast %185 : vector<8x1xf32> to vector<8x4xf32>
    %187 = arith.subf %183, %186 : vector<8x4xf32>
    %188 = math.exp %187 : vector<8x4xf32>
    %cst_53 = arith.constant dense<0.000000e+00> : vector<8xf32>
    %189 = vector.multi_reduction <add>, %188, %cst_53 [1] : vector<8x4xf32> to vector<8xf32>
    %190 = vector.shape_cast %189 : vector<8xf32> to vector<8x1xf32>
    %191 = tpu.reciprocal %190 {approx = true} : vector<8x1xf32> -> vector<8x1xf32>
    %192 = vector.broadcast %191 : vector<8x1xf32> to vector<8x4xf32>
    %193 = arith.mulf %188, %192 : vector<8x4xf32>
    %c0_54 = arith.constant 0 : index
    %c0_55 = arith.constant 0 : index
    %194 = vector.load %arg8[%c0_54, %c0_55] : memref<8x4xf32, #tpu.memory_space<vmem>>, vector<8x4xf32>
    tpu.vector_store %arg8[%c0_54, %c0_55], %193 {strides = array<i32>} : memref<8x4xf32, #tpu.memory_space<vmem>>, vector<8x4xf32>,
    return
  }
}

</mosaic_0001>

<bundles_post_ra>
// kernel: danetwork_forward.1
= control target key start
LH: loop header
LB: loop body
LE: loop exit
PB: predicated region body
PF: predicated region fallthrough
CT: control target
= control target key end

     0   :  { %vm46_vm0 = vcmask 1043456   ;;  %vm42_vm1 = vcmask 31744   ;;  %v1359_v0 = vmov 0.0   ;;  %vm1360_vm2 = vmmov 0   ;;  %s1362_s17 = smov 64   ;;  %s1363_s20 = smov 32   ;;  %s1567_s1 = inlined_call_operand.vmem [shape: f32[4,128], index: 1, kind: input, shape index: {}]   ;;  %s1568_s0 = inlined_call_operand.vmem [shape: f32[8,4], index: 0, kind: input, shape index: {}]   ;;  %s1569_s2 = inlined_call_operand.vmem [shape: f32[32,128], index: 2, kind: input, shape index: {}]   ;;  %s1570_s6 = inlined_call_operand.vmem [shape: f32[1,32], index: 6, kind: input, shape index: {}]   ;;  %s1571_s3 = inlined_call_operand.vmem [shape: f32[1,128], index: 3, kind: input, shape index: {}]   ;;  %s1572_s7 = inlined_call_operand.vmem [shape: f32[1,32], index: 7, kind: input, shape index: {}]   ;;  %s1573_s4 = inlined_call_operand.vmem [shape: f32[32,4], index: 4, kind: input, shape index: {}]   ;;  %s1574_s5 = inlined_call_operand.vmem [shape: f32[1,4], index: 5, kind: input, shape index: {}]   ;;  %s1575_s8 = inlined_call_operand.vmem [shape: f32[8,4], index: 8, kind: output, shape index: {}]  }
   0x1   :  { %1128 = vmatprep.subr.mxu0 %v1359_v0  ;;  %v34_v1 = vld [vmem:[%s1567_s1] sm:$0xf]  ;;  %1130 = vmatprep.mubr.msk.f32.mxu0 %vm1360_vm2, %v1359_v0  ;;  %v1361_v4 = vmov 0.0|0.0   ;;  %v30_v5 = vld [vmem:[%s1569_s2 + $0x8] sm:$0xff]  ;;  %v31_v6 = vld [vmem:[%s1569_s2 + $0x10] sm:$0xff]  ;;  %vm124_vm3 = vcmask 261120  }
   0x2   :  { %v33_v2 = vld [vmem:[%s1568_s0] sm:$0xff]  ;;  %1129 = vmatpush3.msk.msra.mxu0 %vm46_vm0, %v34_v1  ;;  %1232 = vmatprep.subr.bf16.mxu1 %v1361_v4  ;;  %v32_v7 = vld [vmem:[%s1569_s2 + $0x18] sm:$0xff]  ;;  %vm235_vm4 = vcmask 253952  }
   0x3   :  { %v29_v3 = vld [vmem:[%s1569_s2] sm:$0xff]  ;;  %1131 = vmatmul.mubr.msk.f32.vlgmr.msra.gmra.mrb[0].mxu0 %vm42_vm1, %v33_v2  ;;  %1141 = vmatprep.mubr.msk.f32.mxu1 %vm1360_vm2, %v1359_v0  ;;  %v1440_v9 = vpack.c.bf16 %v32_v7, %v31_v6 }
   0x4   :  { %v1432_v8 = vpack.c.bf16 %v30_v5, %v29_v3  ;;  %1238 = vmatprep.subr.bf16.mxu0 %v1361_v4  ;;  %1152 = vmatprep.mubr.msk.f32.mxu0 %vm1360_vm2, %v1359_v0  ;;  %v121_v10 = vld [vmem:[%s1570_s6] sm:$0x1] }
   0x5   :  { %v1059_v11 = vld [vmem:[%s1571_s3] ss:$0 sm:$0xff] }
   0x6   :  { %1234 = vmatpush3.bf16.msra.mxu1 %v1432_v8  ;;  %1240 = vmatpush3.bf16.msra.mxu0 %v1432_v8  ;;  %v1064_v20 = vld [vmem:[%s1572_s7] ss:$0 sm:$0xff] }
   0x7   :  { %1235 = vmatprep.subr.bf16.mxu1 %v1361_v4  ;;  %1241 = vmatprep.subr.bf16.mxu0 %v1361_v4 }
   0xa   :  { %1237 = vmatpush3.bf16.msra.mxu1 %v1440_v9  ;;  %1243 = vmatpush3.bf16.msra.mxu0 %v1440_v9 }
   0xb   :  { %1244 = vmatprep.subr.bf16.mxu1 %v1361_v4  ;;  %1250 = vmatprep.subr.bf16.mxu0 %v1361_v4 }
   0xd   :  { %1142 = vmatmul.mubr.msk.f32.vlgmr.msra.gmra.mrb[0].mxu1 %vm124_vm3, %v121_v10 }
   0xe   :  { %1246 = vmatpush3.bf16.msra.mxu1 %v1432_v8  ;;  %1163 = vmatprep.mubr.msk.f32.mxu1 %vm1360_vm2, %v1359_v0 }
   0xf   :  { %1247 = vmatprep.subr.bf16.mxu1 %v1361_v4 }
  0x12   :  { %1249 = vmatpush3.bf16.msra.mxu1 %v1440_v9 }
  0x13   :  { %1256 = vmatprep.subr.bf16.mxu1 %v1361_v4 }
  0xd6   :  { %v116_v12 = vpop.f32.mrb[0].mxu0 }
  0xd7   :  { %v117_v13 = vadd.f32 %v1059_v11, %v116_v12  ;;  %v1132_v14 = vpop.f32.mrb[1].mxu0 }
  0xd9   :  { %120 = vst [vmem:[#allocation2] sm:$0xff] %v117_v13 }
  0xe0   :  { %v194_v15 = vpop.f32.mrb[0].mxu1  ;;  %v123_v16 = vld [vmem:[#allocation2] sm:$0x1]  ;;  %v237_v35 = vld [vmem:[#allocation2 + $0x1] sm:$0x1] }
  0xe1   :  { %v1143_v17 = vpop.f32.mrb[1].mxu1  ;;  %v198_v18 = vadd.f32 %v194_v15, %v123_v16  ;;  %v340_v53 = vld [vmem:[#allocation2 + $0x2] sm:$0x1]  ;;  %v443_v11 = vld [vmem:[#allocation2 + $0x3] sm:$0x1] }
  0xe3   :  { %1291 = vtanh.f32 %v198_v18  ;;  %v1063_v21 = vmul.f32 -1.442695, %v198_v18 }
  0xe5   :  { %1293 = vpow2.f32 %v1063_v21 }
  0xed   :  { %v1292_v19 = vpop.eup %1291 }
  0xee   :  { %216 = vrot.lane.b32.xlu0 %v1292_v19, %s1362_s17 }
  0xef   :  { %v1294_v22 = vpop.eup %1293 }
  0xf0   :  { %v202_v23 = vadd.f32 1.0, %v1294_v22 }
  0xf2   :  { %211 = vrot.lane.b32.xlu0 %v1064_v20, %s1363_s20  ;;  %1295 = vrcp.f32 %v202_v23 }
  0xfc   :  { %v1296_v24 = vpop.eup %1295 }
 0x160   :  { %v217_v25 = vpop.permute.xlu0 %216 }
 0x161   :  { %v219_v26 = vmul.f32 %v1296_v24, %v217_v25 }
 0x163   :  { %221 = vrot.lane.b32.xlu1 %v219_v26, %s1363_s20 }
 0x164   :  { %v212_v27 = vpop.permute.xlu0 %211 }
 0x165   :  { %v214_v28 = vmul.f32 %v1296_v24, %v212_v27 }
 0x1d5   :  { %v222_v29 = vpop.permute.xlu1 %221 }
 0x1d6   :  { %v224_v30 = vadd.f32 %v222_v29, %v214_v28  ;;  %v546_v29 = vld [vmem:[#allocation2 + $0x4] sm:$0x1] }
 0x1d8   :  { %1297 = vtanh.f32 %v224_v30 }
 0x1e2   :  { %v1298_v31 = vpop.eup %1297 }
 0x1e3   :  { %227 = vrot.lane.b32.xlu1 %v1298_v31, %s1362_s17 }
 0x255   :  { %v228_v32 = vpop.permute.xlu1 %227 }
 0x256   :  { %v230_v33 = vmul.f32 %v1296_v24, %v228_v32 }
 0x258   :  { %232 = vrot.lane.b32.xlu0 %v230_v33, %s1363_s20 }
 0x2ca   :  { %v233_v34 = vpop.permute.xlu0 %232 }
 0x2cb   :  { %236 = vst.msk [vmem:[#allocation3] sm:$0x1] %vm235_vm4, %v233_v34  ;;  %1153 = vmatmul.mubr.msk.f32.vlgmr.msra.gmra.mrb[2].mxu0 %vm124_vm3, %v233_v34 }
 0x2cc   :  { %1252 = vmatpush3.bf16.msra.mxu0 %v1432_v8  ;;  %1174 = vmatprep.mubr.msk.f32.mxu0 %vm1360_vm2, %v1359_v0 }
 0x2cd   :  { %1253 = vmatprep.subr.bf16.mxu0 %v1361_v4 }
 0x2d0   :  { %1255 = vmatpush3.bf16.msra.mxu0 %v1440_v9 }
 0x2d1   :  { %1262 = vmatprep.subr.bf16.mxu0 %v1361_v4 }
 0x39e   :  { %v306_v36 = vpop.f32.mrb[2].mxu0 }
 0x39f   :  { %v310_v37 = vadd.f32 %v306_v36, %v237_v35  ;;  %v1154_v38 = vpop.f32.mrb[3].mxu0 }
 0x3a1   :  { %1299 = vtanh.f32 %v310_v37  ;;  %v1066_v40 = vmul.f32 -1.442695, %v310_v37 }
 0x3a3   :  { %1301 = vpow2.f32 %v1066_v40 }
 0x3ab   :  { %v1300_v39 = vpop.eup %1299 }
 0x3ac   :  { %320 = vrot.lane.b32.xlu1 %v1300_v39, %s1362_s17 }
 0x3ad   :  { %v1302_v41 = vpop.eup %1301 }
 0x3ae   :  { %v314_v42 = vadd.f32 1.0, %v1302_v41 }
 0x3b0   :  { %1303 = vrcp.f32 %v314_v42 }
 0x3ba   :  { %v1304_v43 = vpop.eup %1303 }
 0x3bb   :  { %v318_v46 = vmul.f32 %v1304_v43, %v224_v30 }
 0x41e   :  { %v321_v44 = vpop.permute.xlu1 %320 }
 0x41f   :  { %v323_v45 = vmul.f32 %v1304_v43, %v321_v44 }
 0x421   :  { %325 = vrot.lane.b32.xlu0 %v323_v45, %s1363_s20 }
 0x493   :  { %v326_v47 = vpop.permute.xlu0 %325 }
 0x494   :  { %v328_v48 = vadd.f32 %v326_v47, %v318_v46  ;;  %v649_v47 = vld [vmem:[#allocation2 + $0x5] sm:$0x1] }
 0x496   :  { %1305 = vtanh.f32 %v328_v48 }
 0x4a0   :  { %v1306_v49 = vpop.eup %1305 }
 0x4a1   :  { %331 = vrot.lane.b32.xlu1 %v1306_v49, %s1362_s17 }
 0x513   :  { %v332_v50 = vpop.permute.xlu1 %331 }
 0x514   :  { %v334_v51 = vmul.f32 %v1304_v43, %v332_v50 }
 0x516   :  { %336 = vrot.lane.b32.xlu0 %v334_v51, %s1363_s20 }
 0x588   :  { %v337_v52 = vpop.permute.xlu0 %336 }
 0x589   :  { %339 = vst.msk [vmem:[#allocation3 + $0x1] sm:$0x1] %vm235_vm4, %v337_v52  ;;  %1164 = vmatmul.mubr.msk.f32.vlgmr.msra.gmra.mrb[2].mxu1 %vm124_vm3, %v337_v52 }
 0x58a   :  { %1258 = vmatpush3.bf16.msra.mxu1 %v1432_v8  ;;  %1185 = vmatprep.mubr.msk.f32.mxu1 %vm1360_vm2, %v1359_v0 }
 0x58b   :  { %1259 = vmatprep.subr.bf16.mxu1 %v1361_v4 }
 0x58e   :  { %1261 = vmatpush3.bf16.msra.mxu1 %v1440_v9 }
 0x58f   :  { %1268 = vmatprep.subr.bf16.mxu1 %v1361_v4 }
 0x65c   :  { %v409_v54 = vpop.f32.mrb[2].mxu1 }
 0x65d   :  { %v413_v55 = vadd.f32 %v409_v54, %v340_v53  ;;  %v1165_v56 = vpop.f32.mrb[3].mxu1 }
 0x65f   :  { %1307 = vtanh.f32 %v413_v55  ;;  %v1068_v58 = vmul.f32 -1.442695, %v413_v55 }
 0x661   :  { %1309 = vpow2.f32 %v1068_v58 }
 0x669   :  { %v1308_v57 = vpop.eup %1307 }
 0x66a   :  { %423 = vrot.lane.b32.xlu1 %v1308_v57, %s1362_s17 }
 0x66b   :  { %v1310_v59 = vpop.eup %1309 }
 0x66c   :  { %v417_v60 = vadd.f32 1.0, %v1310_v59 }
 0x66e   :  { %1311 = vrcp.f32 %v417_v60 }
 0x678   :  { %v1312_v61 = vpop.eup %1311 }
 0x679   :  { %v421_v1 = vmul.f32 %v1312_v61, %v328_v48 }
 0x6dc   :  { %v424_v62 = vpop.permute.xlu1 %423 }
 0x6dd   :  { %v426_v63 = vmul.f32 %v1312_v61, %v424_v62 }
 0x6df   :  { %428 = vrot.lane.b32.xlu0 %v426_v63, %s1363_s20  ;;  %v752_v63 = vld [vmem:[#allocation2 + $0x6] sm:$0x1] }
 0x751   :  { %v429_v2 = vpop.permute.xlu0 %428 }
 0x752   :  { %v431_v3 = vadd.f32 %v429_v2, %v421_v1 }
 0x754   :  { %1313 = vtanh.f32 %v431_v3 }
 0x75e   :  { %v1314_v5 = vpop.eup %1313 }
 0x75f   :  { %434 = vrot.lane.b32.xlu1 %v1314_v5, %s1362_s17 }
 0x7d1   :  { %v435_v6 = vpop.permute.xlu1 %434 }
 0x7d2   :  { %v437_v7 = vmul.f32 %v1312_v61, %v435_v6 }
 0x7d4   :  { %439 = vrot.lane.b32.xlu0 %v437_v7, %s1363_s20 }
 0x846   :  { %v440_v10 = vpop.permute.xlu0 %439 }
 0x847   :  { %442 = vst.msk [vmem:[#allocation3 + $0x2] sm:$0x1] %vm235_vm4, %v440_v10  ;;  %1175 = vmatmul.mubr.msk.f32.vlgmr.msra.gmra.mrb[4].mxu0 %vm124_vm3, %v440_v10 }
 0x848   :  { %1264 = vmatpush3.bf16.msra.mxu0 %v1432_v8  ;;  %1196 = vmatprep.mubr.msk.f32.mxu0 %vm1360_vm2, %v1359_v0 }
 0x849   :  { %1265 = vmatprep.subr.bf16.mxu0 %v1361_v4 }
 0x84c   :  { %1267 = vmatpush3.bf16.msra.mxu0 %v1440_v9 }
 0x84d   :  { %1274 = vmatprep.subr.bf16.mxu0 %v1361_v4 }
 0x91a   :  { %v512_v12 = vpop.f32.mrb[4].mxu0 }
 0x91b   :  { %v516_v13 = vadd.f32 %v512_v12, %v443_v11  ;;  %v1176_v14 = vpop.f32.mrb[5].mxu0 }
 0x91d   :  { %1315 = vtanh.f32 %v516_v13  ;;  %v1070_v16 = vmul.f32 -1.442695, %v516_v13 }
 0x91f   :  { %1317 = vpow2.f32 %v1070_v16 }
 0x927   :  { %v1316_v15 = vpop.eup %1315 }
 0x928   :  { %526 = vrot.lane.b32.xlu1 %v1316_v15, %s1362_s17 }
 0x929   :  { %v1318_v17 = vpop.eup %1317 }
 0x92a   :  { %v520_v18 = vadd.f32 1.0, %v1318_v17 }
 0x92c   :  { %1319 = vrcp.f32 %v520_v18 }
 0x936   :  { %v1320_v19 = vpop.eup %1319 }
 0x937   :  { %v524_v22 = vmul.f32 %v1320_v19, %v431_v3 }
 0x99a   :  { %v527_v20 = vpop.permute.xlu1 %526 }
 0x99b   :  { %v529_v21 = vmul.f32 %v1320_v19, %v527_v20  ;;  %v855_v20 = vld [vmem:[#allocation2 + $0x7] sm:$0x1] }
 0x99d   :  { %531 = vrot.lane.b32.xlu0 %v529_v21, %s1363_s20 }
 0xa0f   :  { %v532_v23 = vpop.permute.xlu0 %531 }
 0xa10   :  { %v534_v24 = vadd.f32 %v532_v23, %v524_v22 }
 0xa12   :  { %1321 = vtanh.f32 %v534_v24 }
 0xa1c   :  { %v1322_v25 = vpop.eup %1321 }
 0xa1d   :  { %537 = vrot.lane.b32.xlu1 %v1322_v25, %s1362_s17 }
 0xa8f   :  { %v538_v26 = vpop.permute.xlu1 %537 }
 0xa90   :  { %v540_v27 = vmul.f32 %v1320_v19, %v538_v26 }
 0xa92   :  { %542 = vrot.lane.b32.xlu0 %v540_v27, %s1363_s20 }
 0xb04   :  { %v543_v28 = vpop.permute.xlu0 %542 }
 0xb05   :  { %545 = vst.msk [vmem:[#allocation3 + $0x3] sm:$0x1] %vm235_vm4, %v543_v28  ;;  %1186 = vmatmul.mubr.msk.f32.vlgmr.msra.gmra.mrb[4].mxu1 %vm124_vm3, %v543_v28 }
 0xb06   :  { %1270 = vmatpush3.bf16.msra.mxu1 %v1432_v8  ;;  %1207 = vmatprep.mubr.msk.f32.mxu1 %vm1360_vm2, %v1359_v0 }
 0xb07   :  { %1271 = vmatprep.subr.bf16.mxu1 %v1361_v4 }
 0xb0a   :  { %1273 = vmatpush3.bf16.msra.mxu1 %v1440_v9 }
 0xb0b   :  { %1280 = vmatprep.subr.bf16.mxu1 %v1361_v4 }
 0xbd8   :  { %v615_v30 = vpop.f32.mrb[4].mxu1 }
 0xbd9   :  { %v619_v31 = vadd.f32 %v615_v30, %v546_v29  ;;  %v1187_v32 = vpop.f32.mrb[5].mxu1 }
 0xbdb   :  { %1323 = vtanh.f32 %v619_v31  ;;  %v1072_v34 = vmul.f32 -1.442695, %v619_v31 }
 0xbdd   :  { %1325 = vpow2.f32 %v1072_v34 }
 0xbe5   :  { %v1324_v33 = vpop.eup %1323 }
 0xbe6   :  { %629 = vrot.lane.b32.xlu1 %v1324_v33, %s1362_s17 }
 0xbe7   :  { %v1326_v35 = vpop.eup %1325 }
 0xbe8   :  { %v623_v36 = vadd.f32 1.0, %v1326_v35  ;;  %v959_v35 = vld [vmem:[%s1573_s4] sm:$0xff] }
 0xbea   :  { %1327 = vrcp.f32 %v623_v36  ;;  %v960_v36 = vld [vmem:[%s1573_s4 + $0x8] sm:$0xff] }
 0xbf4   :  { %v1328_v37 = vpop.eup %1327 }
 0xbf5   :  { %v627_v40 = vmul.f32 %v1328_v37, %v534_v24 }
 0xc58   :  { %v630_v38 = vpop.permute.xlu1 %629 }
 0xc59   :  { %v632_v39 = vmul.f32 %v1328_v37, %v630_v38  ;;  %v1281_v38 = vpack.c.bf16 %v960_v36, %v959_v35 }
 0xc5b   :  { %634 = vrot.lane.b32.xlu0 %v632_v39, %s1363_s20  ;;  %v962_v39 = vld [vmem:[%s1573_s4 + $0x18] sm:$0xff] }
 0xccd   :  { %v635_v41 = vpop.permute.xlu0 %634 }
 0xcce   :  { %v637_v42 = vadd.f32 %v635_v41, %v627_v40 }
 0xcd0   :  { %1329 = vtanh.f32 %v637_v42 }
 0xcda   :  { %v1330_v43 = vpop.eup %1329 }
 0xcdb   :  { %640 = vrot.lane.b32.xlu1 %v1330_v43, %s1362_s17 }
 0xd4d   :  { %v641_v44 = vpop.permute.xlu1 %640 }
 0xd4e   :  { %v643_v45 = vmul.f32 %v1328_v37, %v641_v44  ;;  %v961_v37 = vld [vmem:[%s1573_s4 + $0x10] sm:$0xff] }
 0xd4f   :  { %v1284_v40 = vpack.c.bf16 %v962_v39, %v961_v37 }
 0xd50   :  { %645 = vrot.lane.b32.xlu0 %v643_v45, %s1363_s20  ;;  %v1079_v45 = vld [vmem:[%s1574_s5] ss:$0 sm:$0xff] }
 0xdc2   :  { %v646_v46 = vpop.permute.xlu0 %645 }
 0xdc3   :  { %648 = vst.msk [vmem:[#allocation3 + $0x4] sm:$0x1] %vm235_vm4, %v646_v46  ;;  %1197 = vmatmul.mubr.msk.f32.vlgmr.msra.gmra.mrb[6].mxu0 %vm124_vm3, %v646_v46 }
 0xdc4   :  { %1276 = vmatpush3.bf16.msra.mxu0 %v1432_v8  ;;  %1218 = vmatprep.mubr.msk.f32.mxu0 %vm1360_vm2, %v1359_v0 }
 0xdc5   :  { %1277 = vmatprep.subr.bf16.mxu0 %v1361_v4 }
 0xdc8   :  { %1279 = vmatpush3.bf16.msra.mxu0 %v1440_v9 }
 0xe96   :  { %v718_v48 = vpop.f32.mrb[6].mxu0 }
 0xe97   :  { %v722_v49 = vadd.f32 %v718_v48, %v649_v47  ;;  %v1198_v50 = vpop.f32.mrb[7].mxu0 }
 0xe99   :  { %1331 = vtanh.f32 %v722_v49  ;;  %v1074_v52 = vmul.f32 -1.442695, %v722_v49 }
 0xe9b   :  { %1333 = vpow2.f32 %v1074_v52 }
 0xea3   :  { %v1332_v51 = vpop.eup %1331 }
 0xea4   :  { %732 = vrot.lane.b32.xlu1 %v1332_v51, %s1362_s17 }
 0xea5   :  { %v1334_v53 = vpop.eup %1333 }
 0xea6   :  { %v726_v54 = vadd.f32 1.0, %v1334_v53 }
 0xea8   :  { %1335 = vrcp.f32 %v726_v54 }
 0xeb2   :  { %v1336_v8 = vpop.eup %1335 }
 0xeb3   :  { %v730_v57 = vmul.f32 %v1336_v8, %v637_v42 }
 0xf16   :  { %v733_v55 = vpop.permute.xlu1 %732 }
 0xf17   :  { %v735_v56 = vmul.f32 %v1336_v8, %v733_v55 }
 0xf19   :  { %737 = vrot.lane.b32.xlu0 %v735_v56, %s1363_s20 }
 0xf8b   :  { %v738_v9 = vpop.permute.xlu0 %737 }
 0xf8c   :  { %v740_v58 = vadd.f32 %v738_v9, %v730_v57 }
 0xf8e   :  { %1337 = vtanh.f32 %v740_v58 }
 0xf98   :  { %v1338_v59 = vpop.eup %1337 }
 0xf99   :  { %743 = vrot.lane.b32.xlu1 %v1338_v59, %s1362_s17 }
0x100b   :  { %v744_v60 = vpop.permute.xlu1 %743 }
0x100c   :  { %v746_v61 = vmul.f32 %v1336_v8, %v744_v60 }
0x100e   :  { %748 = vrot.lane.b32.xlu0 %v746_v61, %s1363_s20 }
0x1080   :  { %v749_v62 = vpop.permute.xlu0 %748 }
0x1081   :  { %751 = vst.msk [vmem:[#allocation3 + $0x5] sm:$0x1] %vm235_vm4, %v749_v62  ;;  %1208 = vmatmul.mubr.msk.f32.vlgmr.msra.gmra.mrb[6].mxu1 %vm124_vm3, %v749_v62 }
0x1082   :  { %1229 = vmatprep.mubr.msk.f32.mxu1 %vm1360_vm2, %v1359_v0  ;;  %1282 = vmatpush3.bf16.msra.mxu1 %v1281_v38 }
0x1083   :  { %1283 = vmatprep.subr.bf16.mxu1 %v1361_v4 }
0x1086   :  { %1285 = vmatpush3.bf16.msra.mxu1 %v1284_v40 }
0x1154   :  { %v821_v1 = vpop.f32.mrb[6].mxu1 }
0x1155   :  { %v825_v2 = vadd.f32 %v821_v1, %v752_v63  ;;  %v1209_v3 = vpop.f32.mrb[7].mxu1 }
0x1157   :  { %1339 = vtanh.f32 %v825_v2  ;;  %v1076_v6 = vmul.f32 -1.442695, %v825_v2 }
0x1159   :  { %1341 = vpow2.f32 %v1076_v6 }
0x1161   :  { %v1340_v5 = vpop.eup %1339 }
0x1162   :  { %835 = vrot.lane.b32.xlu1 %v1340_v5, %s1362_s17 }
0x1163   :  { %v1342_v7 = vpop.eup %1341 }
0x1164   :  { %v829_v10 = vadd.f32 1.0, %v1342_v7 }
0x1166   :  { %1343 = vrcp.f32 %v829_v10 }
0x1170   :  { %v1344_v11 = vpop.eup %1343 }
0x1171   :  { %v833_v14 = vmul.f32 %v1344_v11, %v740_v58 }
0x11d4   :  { %v836_v12 = vpop.permute.xlu1 %835 }
0x11d5   :  { %v838_v13 = vmul.f32 %v1344_v11, %v836_v12 }
0x11d7   :  { %840 = vrot.lane.b32.xlu0 %v838_v13, %s1363_s20 }
0x1249   :  { %v841_v0 = vpop.permute.xlu0 %840 }
0x124a   :  { %v843_v15 = vadd.f32 %v841_v0, %v833_v14 }
0x124c   :  { %1345 = vtanh.f32 %v843_v15 }
0x1256   :  { %v1346_v16 = vpop.eup %1345 }
0x1257   :  { %846 = vrot.lane.b32.xlu1 %v1346_v16, %s1362_s17 }
0x12c9   :  { %v847_v17 = vpop.permute.xlu1 %846 }
0x12ca   :  { %v849_v18 = vmul.f32 %v1344_v11, %v847_v17 }
0x12cc   :  { %851 = vrot.lane.b32.xlu0 %v849_v18, %s1363_s20 }
0x133e   :  { %v852_v19 = vpop.permute.xlu0 %851 }
0x133f   :  { %854 = vst.msk [vmem:[#allocation3 + $0x6] sm:$0x1] %vm235_vm4, %v852_v19  ;;  %1219 = vmatmul.mubr.msk.f32.vlgmr.msra.gmra.mrb[8].mxu0 %vm124_vm3, %v852_v19 }
0x1412   :  { %v924_v21 = vpop.f32.mrb[8].mxu0 }
0x1413   :  { %v928_v22 = vadd.f32 %v924_v21, %v855_v20  ;;  %v1220_v23 = vpop.f32.mrb[9].mxu0 }
0x1415   :  { %1347 = vtanh.f32 %v928_v22  ;;  %v1078_v25 = vmul.f32 -1.442695, %v928_v22 }
0x1417   :  { %1349 = vpow2.f32 %v1078_v25 }
0x141f   :  { %v1348_v24 = vpop.eup %1347 }
0x1420   :  { %938 = vrot.lane.b32.xlu1 %v1348_v24, %s1362_s17 }
0x1421   :  { %v1350_v26 = vpop.eup %1349 }
0x1422   :  { %v932_v27 = vadd.f32 1.0, %v1350_v26 }
0x1424   :  { %1351 = vrcp.f32 %v932_v27 }
0x142e   :  { %v1352_v28 = vpop.eup %1351 }
0x142f   :  { %v936_v31 = vmul.f32 %v1352_v28, %v843_v15 }
0x1492   :  { %v939_v29 = vpop.permute.xlu1 %938 }
0x1493   :  { %v941_v30 = vmul.f32 %v1352_v28, %v939_v29 }
0x1495   :  { %943 = vrot.lane.b32.xlu0 %v941_v30, %s1363_s20 }
0x1507   :  { %v944_v32 = vpop.permute.xlu0 %943 }
0x1508   :  { %v946_v33 = vadd.f32 %v944_v32, %v936_v31 }
0x150a   :  { %1353 = vtanh.f32 %v946_v33 }
0x1514   :  { %v1354_v34 = vpop.eup %1353 }
0x1515   :  { %949 = vrot.lane.b32.xlu1 %v1354_v34, %s1362_s17 }
0x1587   :  { %v950_v41 = vpop.permute.xlu1 %949 }
0x1588   :  { %v952_v42 = vmul.f32 %v1352_v28, %v950_v41 }
0x158a   :  { %954 = vrot.lane.b32.xlu0 %v952_v42, %s1363_s20 }
0x15fc   :  { %v955_v43 = vpop.permute.xlu0 %954 }
0x15fd   :  { %957 = vst.msk [vmem:[#allocation3 + $0x7] sm:$0x1] %vm235_vm4, %v955_v43 }
0x1604   :  { %v958_v44 = vld [vmem:[#allocation3] sm:$0xff] }
0x1605   :  { %1230 = vmatmul.mubr.msk.f32.vlgmr.msra.gmra.mrb[8].mxu1 %vm124_vm3, %v958_v44 }
0x16d8   :  { %v1039_v46 = vpop.f32.mrb[8].mxu1 }
0x16d9   :  { %v1040_v47 = vadd.f32 %v1079_v45, %v1039_v46  ;;  %v1231_v48 = vpop.f32.mrb[9].mxu1 }
0x16db   :  { %v1043_v4 = vsel %vm42_vm1, %v1040_v47, -inf }
0x16dc   :  { %1044 = vmax.xlane.f32.xlu1 %v1043_v4 }
0x1769   :  { %v1045_v49 = vpop.xlane.xlu1 %1044 }
0x176a   :  { %v1046_v50 = vsub.f32 %v1040_v47, %v1045_v49 }
0x176c   :  { %v1047_v51 = vmul.f32 1.442695, %v1046_v50 }
0x176e   :  { %1355 = vpow2.f32 %v1047_v51 }
0x1778   :  { %v1356_v52 = vpop.eup %1355 }
0x1779   :  { %v1049_v53 = vsel %vm42_vm1, %v1356_v52, 0.0 }
0x177a   :  { %1050 = vadd.xlane.f32.xlu0 %v1049_v53 }
0x1807   :  { %v1051_v54 = vpop.xlane.xlu0 %1050 }
0x1808   :  { %1357 = vrcp.f32 %v1051_v54 }
0x1812   :  { %v1358_v8 = vpop.eup %1357 }
0x1813   :  { %v1053_v55 = vmul.f32 %v1358_v8, %v1356_v52 }
0x1815   :  { %1054 = vst.msk [vmem:[%s1575_s8] sm:$0xff] %vm42_vm1, %v1053_v55 }

</bundles_post_ra>
